<compile_context>
chip_gen: v7x
topology: tpu7x:2x2x1
jax: 0.10.0
libtpu: 0.0.40
codegen_flags: <defaults>
</compile_context>

<pallas_src>
import math

import jax
import jax.numpy as jnp
from jax.experimental import pallas as pl
from jax.experimental.pallas import tpu as pltpu

LANE = 128


def _round_up(n, m):
    return (n + m - 1) // m * m


def _msa_kernel(x_ref, wqkv_ref, bqkv_ref, wo_ref, bo_ref, o_ref):
    """One grid step == one batch element. x_ref: (1, S, Ep)."""
    x = x_ref[0]                      # (S, Ep)
    ep = x.shape[-1]

    # Fused Q/K/V projection: one (S, Ep) @ (Ep, 3*Ep) MXU push.
    qkv = jnp.dot(x, wqkv_ref[...], preferred_element_type=jnp.float32)
    qkv = qkv + bqkv_ref[...]
    q = qkv[:, :ep]                   # 1/sqrt(d) scale pre-folded into wq/bq
    k = qkv[:, ep:2 * ep]
    v = qkv[:, 2 * ep:]

    # Scores: contract embed dims directly (no k.T materialization).
    attn = jax.lax.dot_general(
        q, k, (((1,), (1,)), ((), ())), preferred_element_type=jnp.float32)

    # Numerically-stable softmax, exact f32 (kernel is MXU-bound, divide is free).
    attn_max = jnp.max(attn, axis=-1, keepdims=True)
    e = jnp.exp(attn - attn_max)
    scores = e / jnp.sum(e, axis=-1, keepdims=True)

    # Weighted sum of values + output projection.
    out = jnp.dot(scores, v, preferred_element_type=jnp.float32)
    y = jnp.dot(out, wo_ref[...], preferred_element_type=jnp.float32)
    y = y + bo_ref[...]
    o_ref[0] = y.astype(o_ref.dtype)


def prepare_msa_params(wq, bq, wk, bk, wv, bv, wo, bo, embed_dim):
    """One-time weight packing (hoisted out of the per-call jitted path).

    torch (out, in) layout -> kernel (in, out), zero-padded to Ep=128 lanes,
    Q/K/V fused into a single (Ep, 3*Ep) slab, 1/sqrt(d) folded into wq/bq.
    """
    E = embed_dim
    Ep = _round_up(max(E, LANE), LANE)
    scale = 1.0 / math.sqrt(E)

    def pad_w(w):
        return jnp.pad(w.T, ((0, Ep - E), (0, Ep - E)))

    def pad_b(b):
        return jnp.pad(b, (0, Ep - E))

    w_qkv = jnp.concatenate(
        [pad_w(wq * scale), pad_w(wk), pad_w(wv)], axis=1)          # (Ep, 3Ep)
    b_qkv = jnp.concatenate(
        [pad_b(bq * scale), pad_b(bk), pad_b(bv)]).reshape(1, 3 * Ep)
    wo_p = pad_w(wo)                                                 # (Ep, Ep)
    bo_p = pad_b(bo).reshape(1, Ep)
    return w_qkv, b_qkv, wo_p, bo_p, Ep


def msa_forward(x, w_qkv, b_qkv, wo_p, bo_p):
    """Single-head self-attention. x: [B, S, E] f32; weights pre-packed."""
    B, S, E = x.shape
    Ep = w_qkv.shape[0]

    # Zero-pad the lane (embed) dim to 128; padding is mathematically inert.
    x_p = jnp.pad(x, ((0, 0), (0, 0), (0, Ep - E)))

    y_p = pl.pallas_call(
        _msa_kernel,
        out_shape=jax.ShapeDtypeStruct((B, S, Ep), x.dtype),
        grid_spec=pltpu.PrefetchScalarGridSpec(
            num_scalar_prefetch=0,
            grid=(B,),
            in_specs=[
                pl.BlockSpec((1, S, Ep), lambda b: (b, 0, 0)),      # x (per batch)
                pl.BlockSpec((Ep, 3 * Ep), lambda b: (0, 0)),       # fused QKV W
                pl.BlockSpec((1, 3 * Ep), lambda b: (0, 0)),        # fused QKV b
                pl.BlockSpec((Ep, Ep), lambda b: (0, 0)),           # out-proj W
                pl.BlockSpec((1, Ep), lambda b: (0, 0)),            # out-proj b
            ],
            out_specs=pl.BlockSpec((1, S, Ep), lambda b: (b, 0, 0)),
        ),
        compiler_params=pltpu.CompilerParams(
            dimension_semantics=("parallel",)),     # v7x megacore; neutral on v5e/v6e
    )(x_p, w_qkv, b_qkv, wo_p, bo_p)

    # Strip the lane padding.
    return y_p[:, :, :E]


def _init_linear(key, embed_dim):
    """Deterministic torch.nn.Linear-style init (uniform in +-1/sqrt(fan_in))."""
    kw, kb = jax.random.split(key)
    bound = 1.0 / math.sqrt(embed_dim)
    w = jax.random.uniform(kw, (embed_dim, embed_dim), jnp.float32, -bound, bound)
    b = jax.random.uniform(kb, (embed_dim,), jnp.float32, -bound, bound)
    return w, b  # w is torch-layout (out, in)


def _reference_forward(x, torch_params):
    """Pure-JAX reference mirroring the PyTorch module exactly (mask=None path)."""
    (wq, bq), (wk, bk), (wv, bv), (wo, bo) = torch_params
    q = x @ wq.T + bq
    k = x @ wk.T + bk
    v = x @ wv.T + bv
    scale = 1.0 / math.sqrt(k.shape[-1])
    attn = jnp.einsum("bqe,bke->bqk", q, k) * scale
    scores = jax.nn.softmax(attn, axis=-1)
    out = jnp.einsum("bqk,bke->bqe", scores, v)
    return out @ wo.T + bo


if __name__ == "__main__":
    B, S, E = 2, 8, 32  # small shapes: batch=2, seq=8, embed_dim=32

    root = jax.random.PRNGKey(0)
    kx, kq, kk, kv, ko = jax.random.split(root, 5)

    x = jax.random.normal(kx, (B, S, E), jnp.float32)

    wq, bq = _init_linear(kq, E)
    wk, bk = _init_linear(kk, E)
    wv, bv = _init_linear(kv, E)
    wo, bo = _init_linear(ko, E)

    # One-time parameter prep (outside the per-call jitted path).
    w_qkv, b_qkv, wo_p, bo_p, _ = prepare_msa_params(wq, bq, wk, bk, wv, bv,
                                                     wo, bo, E)
    w_qkv, b_qkv, wo_p, bo_p = jax.block_until_ready((w_qkv, b_qkv, wo_p, bo_p))

    msa = jax.jit(msa_forward)
    y = msa(x, w_qkv, b_qkv, wo_p, bo_p)
    jax.block_until_ready(y)

    y_ref = _reference_forward(x, [(wq, bq), (wk, bk), (wv, bv), (wo, bo)])
    assert y.shape == (B, S, E)
    # Exact-f32 softmax now; only MXU accumulation-order differences remain.
    assert jnp.allclose(y, y_ref, atol=1e-4, rtol=1e-4), "Pallas kernel mismatch"

    print("KERNEL_OK")
</pallas_src>

<mosaic_0001>
module attributes {stable_mosaic.version = 11 : i64} {
  func.func @_msa_kernel(%arg0: i32, %arg1: memref<1x8x128xf32, #tpu.memory_space<vmem>>, %arg2: memref<128x384xf32, #tpu.memory_space<vmem>>, %arg3: memref<1x384xf32, #tpu.memory_space<vmem>>, %arg4: memref<128x128xf32, #tpu.memory_space<vmem>>, %arg5: memref<1x128xf32, #tpu.memory_space<vmem>>, %arg6: memref<1x8x128xf32, #tpu.memory_space<vmem>>) attributes {dimension_semantics = [#tpu.dimension_semantics<parallel>], iteration_bounds = array<i64: 2>, scalar_prefetch = 0 : i64, scratch_operands = 0 : i64, tpu.core_type = #tpu.core_type<tc>, window_params = [{transform_indices = @transform_0, window_bounds = array<i64: 1, 8, 128>}, {pipeline_mode = #tpu.pipeline_mode<synchronous>, transform_indices = @transform_1, window_bounds = array<i64: 128, 384>}, {pipeline_mode = #tpu.pipeline_mode<synchronous>, transform_indices = @transform_2, window_bounds = array<i64: 1, 384>}, {pipeline_mode = #tpu.pipeline_mode<synchronous>, transform_indices = @transform_3, window_bounds = array<i64: 128, 128>}, {pipeline_mode = #tpu.pipeline_mode<synchronous>, transform_indices = @transform_4, window_bounds = array<i64: 1, 128>}, {transform_indices = @transform_5, window_bounds = array<i64: 1, 8, 128>}]} {
    %c0 = arith.constant 0 : index
    %c0_0 = arith.constant 0 : index
    %c0_1 = arith.constant 0 : index
    %0 = vector.load %arg1[%c0, %c0_0, %c0_1] : memref<1x8x128xf32, #tpu.memory_space<vmem>>, vector<1x8x128xf32>
    %1 = vector.shape_cast %0 : vector<1x8x128xf32> to vector<8x128xf32>
    %c0_2 = arith.constant 0 : index
    %c0_3 = arith.constant 0 : index
    %2 = vector.load %arg2[%c0_2, %c0_3] : memref<128x384xf32, #tpu.memory_space<vmem>>, vector<128x384xf32>
    %cst = arith.constant dense<0.000000e+00> : vector<8x384xf32>
    %3 = tpu.matmul %1, %2, %cst {dimension_numbers = #tpu.dot_dimension_numbers<[1], [0], [0], [1], [0, 0, 1, 1], [], []>} : vector<8x128xf32>, vector<128x384xf32>, vector<8x384xf32> -> vector<8x384xf32>
    %c0_4 = arith.constant 0 : index
    %c0_5 = arith.constant 0 : index
    %4 = vector.load %arg3[%c0_4, %c0_5] : memref<1x384xf32, #tpu.memory_space<vmem>>, vector<1x384xf32>
    %5 = vector.broadcast %4 : vector<1x384xf32> to vector<8x384xf32>
    %6 = arith.addf %3, %5 : vector<8x384xf32>
    %7 = vector.extract_strided_slice %6 {offsets = [0, 0], sizes = [8, 128], strides = [1, 1]} : vector<8x384xf32> to vector<8x128xf32>
    %8 = vector.extract_strided_slice %6 {offsets = [0, 128], sizes = [8, 128], strides = [1, 1]} : vector<8x384xf32> to vector<8x128xf32>
    %9 = vector.extract_strided_slice %6 {offsets = [0, 256], sizes = [8, 128], strides = [1, 1]} : vector<8x384xf32> to vector<8x128xf32>
    %cst_6 = arith.constant dense<0.000000e+00> : vector<8x8xf32>
    %10 = tpu.matmul %7, %8, %cst_6 {dimension_numbers = #tpu.dot_dimension_numbers<[1], [1], [0], [0], [0, 0, 1, 0], [], []>} : vector<8x128xf32>, vector<8x128xf32>, vector<8x8xf32> -> vector<8x8xf32>
    %cst_7 = arith.constant dense<0xFF800000> : vector<8xf32>
    %11 = vector.multi_reduction <maximumf>, %10, %cst_7 [1] : vector<8x8xf32> to vector<8xf32>
    %12 = vector.shape_cast %11 : vector<8xf32> to vector<8x1xf32>
    %13 = vector.broadcast %12 : vector<8x1xf32> to vector<8x8xf32>
    %14 = arith.subf %10, %13 : vector<8x8xf32>
    %15 = math.exp %14 : vector<8x8xf32>
    %cst_8 = arith.constant dense<0.000000e+00> : vector<8xf32>
    %16 = vector.multi_reduction <add>, %15, %cst_8 [1] : vector<8x8xf32> to vector<8xf32>
    %17 = vector.shape_cast %16 : vector<8xf32> to vector<8x1xf32>
    %18 = vector.broadcast %17 : vector<8x1xf32> to vector<8x8xf32>
    %19 = arith.divf %15, %18 : vector<8x8xf32>
    %cst_9 = arith.constant dense<0.000000e+00> : vector<8x128xf32>
    %20 = tpu.matmul %19, %9, %cst_9 {dimension_numbers = #tpu.dot_dimension_numbers<[1], [0], [0], [1], [0, 0, 1, 1], [], []>} : vector<8x8xf32>, vector<8x128xf32>, vector<8x128xf32> -> vector<8x128xf32>
    %c0_10 = arith.constant 0 : index
    %c0_11 = arith.constant 0 : index
    %21 = vector.load %arg4[%c0_10, %c0_11] : memref<128x128xf32, #tpu.memory_space<vmem>>, vector<128x128xf32>
    %cst_12 = arith.constant dense<0.000000e+00> : vector<8x128xf32>
    %22 = tpu.matmul %20, %21, %cst_12 {dimension_numbers = #tpu.dot_dimension_numbers<[1], [0], [0], [1], [0, 0, 1, 1], [], []>} : vector<8x128xf32>, vector<128x128xf32>, vector<8x128xf32> -> vector<8x128xf32>
    %c0_13 = arith.constant 0 : index
    %c0_14 = arith.constant 0 : index
    %23 = vector.load %arg5[%c0_13, %c0_14] : memref<1x128xf32, #tpu.memory_space<vmem>>, vector<1x128xf32>
    %24 = vector.broadcast %23 : vector<1x128xf32> to vector<8x128xf32>
    %25 = arith.addf %22, %24 : vector<8x128xf32>
    %c0_15 = arith.constant 0 : index
    %c0_16 = arith.constant 0 : index
    %c0_17 = arith.constant 0 : index
    %26 = vector.load %arg6[%c0_15, %c0_16, %c0_17] : memref<1x8x128xf32, #tpu.memory_space<vmem>>, vector<1x8x128xf32>
    %27 = vector.shape_cast %26 : vector<1x8x128xf32> to vector<8x128xf32>
    %28 = vector.shape_cast %25 : vector<8x128xf32> to vector<1x8x128xf32>
    tpu.vector_store %arg6[%c0_15, %c0_16, %c0_17], %28 {strides = array<i32>} : memref<1x8x128xf32, #tpu.memory_space<vmem>>, vector<1x8x128xf32>,
    return
  }
  func.func @transform_0(%arg0: i32) -> (i32, i32, i32) {
    %c0_i32 = arith.constant 0 : i32
    %c0_i32_0 = arith.constant 0 : i32
    %c0_i32_1 = arith.constant 0 : i32
    return %arg0, %c0_i32, %c0_i32_0 : i32, i32, i32
  }
  func.func @transform_1(%arg0: i32) -> (i32, i32) {
    %c0_i32 = arith.constant 0 : i32
    %c0_i32_0 = arith.constant 0 : i32
    %c0_i32_1 = arith.constant 0 : i32
    return %c0_i32, %c0_i32_0 : i32, i32
  }
  func.func @transform_2(%arg0: i32) -> (i32, i32) {
    %c0_i32 = arith.constant 0 : i32
    %c0_i32_0 = arith.constant 0 : i32
    %c0_i32_1 = arith.constant 0 : i32
    return %c0_i32, %c0_i32_0 : i32, i32
  }
  func.func @transform_3(%arg0: i32) -> (i32, i32) {
    %c0_i32 = arith.constant 0 : i32
    %c0_i32_0 = arith.constant 0 : i32
    %c0_i32_1 = arith.constant 0 : i32
    return %c0_i32, %c0_i32_0 : i32, i32
  }
  func.func @transform_4(%arg0: i32) -> (i32, i32) {
    %c0_i32 = arith.constant 0 : i32
    %c0_i32_0 = arith.constant 0 : i32
    %c0_i32_1 = arith.constant 0 : i32
    return %c0_i32, %c0_i32_0 : i32, i32
  }
  func.func @transform_5(%arg0: i32) -> (i32, i32, i32) {
    %c0_i32 = arith.constant 0 : i32
    %c0_i32_0 = arith.constant 0 : i32
    %c0_i32_1 = arith.constant 0 : i32
    return %arg0, %c0_i32, %c0_i32_0 : i32, i32, i32
  }
}

</mosaic_0001>

<bundles_post_ra>
// kernel: msa_forward.1
= control target key start
LH: loop header
LB: loop body
LE: loop exit
PB: predicated region body
PF: predicated region fallthrough
CT: control target
= control target key end

     0   :  { %10 = vsyncpa [#allocation3], 0  ;;  %s1464_s0 = inlined_call_operand.vmem [shape: f32[2,8,128], index: 0, kind: input, shape index: {}]   ;;  %s1465_s1 = inlined_call_operand.hbm [shape: f32[128,384], index: 1, kind: input, shape index: {}]   ;;  %s1466_s2 = inlined_call_operand.vmem [shape: f32[1,384], index: 2, kind: input, shape index: {}]   ;;  %s1467_s3 = inlined_call_operand.hbm [shape: f32[128,128], index: 3, kind: input, shape index: {}]   ;;  %s1468_s4 = inlined_call_operand.vmem [shape: f32[1,128], index: 4, kind: input, shape index: {}]   ;;  %s1469_s5 = inlined_call_operand.hbm [shape: f32[2,8,128], index: 5, kind: output, shape index: {}]  }
   0x1   :  { %11 = vsyncpa [#allocation6], 0 }
   0x2   :  { %12 = vsyncpa [#allocation4], 0 }
   0x3   :  { %14 = vsyncpa [#allocation4 + $0x1], 0  ;;  %s1254_s18 = smov 0   ;;  %s1256_s19 = smov 0  }
   0x4   :  { %s1258_s20 = smov 0   ;;  %s1260_s21 = smov 0  }
   0x5 LB: > { %s1275_s22 = sadd.s32 4294967295, %s1212_s21   ;;  %s801_s23 = sadd.s32 4294967294, %s1212_s21   ;;  %s1212_s21 = sphi %s1260_s21, %s1487_s21   ;;  %s1208_s20 = sphi %s1258_s20, %s1486_s20   ;;  %s1204_s19 = sphi %s1256_s19, %s1485_s19   ;;  %s1200_s18 = sphi %s1254_s18, %s1484_s18  }
   0x6   : > { %s1279_s24 = sadd.s32 1, %s1212_s21   ;;  %s137_s25 = sadd.s32 1, %s1208_s20 }
   0x7   : > { %s134_s26 = ssub.s32 %s1212_s21, %s1279_s24  ;;  %p147_p0 = scmp.ne.s32.totalorder %s1208_s20, %s1204_s19 }
   0x8   : > { %p135_p1 = scmp.eq.s32.totalorder %s134_s26, 0  ;;  %p148_p2 = scmp.eq.s32.totalorder %s1275_s22, 1 }
   0x9   : > { %p153_p3 = scmp.ne.s32.totalorder %s1204_s19, %s1200_s18  ;;  %p154_p4 = scmp.eq.s32.totalorder %s801_s23, 1 }
   0xa   : > { %s1290_s27 = scalar_select %p135_p1, %s1208_s20, %s137_s25  }
   0xb   : > { %p1292_p5 = por %p148_p2, %p147_p0  ;;  %p1296_p6 = por %p154_p4, %p153_p3 }
   0xc   : > { %p802_p7 = scmp.ge.s32.totalorder %s1212_s21, 1  ;;  %p161_p8 = scmp.lt.s32.totalorder %s1212_s21, 3 }
   0xd   : > { %s1473_s28 = scalar_select %p1292_p5, 1, 0 }
   0xe   : > { %s1474_s29 = scalar_select %p1296_p6, 1, 0 }
   0xf   : > { %p1470_p9 = scmp.eq.s32.totalorder %s1275_s22, 0  ;;  %p1303_p10 = pnand %p802_p7, %p161_p8 }
  0x10   : > { %s1214_s6 = smov [#allocation2]   ;;  %s1215_s9 = smov [#allocation5]  }
  0x11   : > { %s1475_s30 = scalar_select %p1303_p10, 1, 0 }
  0x12   : > { %s173_s7 = sshll.u32 %s1214_s6, 4  ;;  %p1025_p11 = pneg %p1303_p10  ;;  %s174_s7 = int_to_ptr.vmem [resolvable:$true] %s173_s7 }
  0x13   : > { %s189_s10 = sshll.u32 %s1215_s9, 4  ;;  %s1086_s13 = scalar_lea.hbm %s1465_s1, 6144  ;;  %s1315_s10 = int_to_ptr.vmem [resolvable:$true] %s189_s10 }
  0x14   : > { %p1311_p12 = pnand %p1470_p9, %p1025_p11  ;;  %p1087_p13 = scmp.ne.s32.totalorder %s1465_s1, %s1086_s13 }
  0x15   : > { %p1093_p3 = scmp.lt.u32.totalorder %s1086_s13, %s1465_s1 }
  0x16   : > { %p1088_p0 = pneg %p1311_p12 }
  0x18   : > { %p1089_p1 = pnand %p1088_p0, %p1087_p13 }
  0x1a   : > { %p1090_p2 = pneg %p1089_p1 }
  0x1c   : > { %p1095_p4 = pnand %p1093_p3, %p1090_p2 }
  0x1e   : > { %1098 = shalt.err (!%p1095_p4)
}
  0x1f   : > { %s1099_s23 = scalar_lea.vmem %s174_s7, 6144  ;;  %p1107_p9 = scmp.lt.s32.totalorder %s174_s7, %s174_s7 }
  0x20   : > { %p1100_p7 = scmp.ne.s32.totalorder %s174_s7, %s1099_s23  ;;  %p1108_p6 = scmp.lt.s32.totalorder %s1099_s23, %s1099_s23 }
  0x22   : > { %p1102_p8 = pnand %p1100_p7, %p1088_p0  ;;  %p1109_p5 = por %p1108_p6, %p1107_p9 }
  0x24   : > { %p1103_p11 = pneg %p1102_p8 }
  0x26   : > { %p1110_p10 = pnand %p1109_p5, %p1103_p11 }
  0x28   : > { %1113 = shalt.err (!%p1110_p10)
}
  0x29   : > { %s1216_s25 = smov 384   ;;  %s1217_s26 = smov 24  }
  0x2a   : > { %1028 = dma.hbm_to_vmem [thread:$0]  (!%p1311_p12), %s1465_s1, 6144, %s174_s7, [#allocation3], %s1216_s25, %s1216_s25, %s1217_s26  }
  0x2b   : > { %s1114_s13 = scalar_lea.hbm %s1467_s3, 2048 }
  0x2c   : > { %p1115_p13 = scmp.ne.s32.totalorder %s1467_s3, %s1114_s13  ;;  %p1121_p9 = scmp.lt.u32.totalorder %s1114_s13, %s1467_s3 }
  0x2e   : > { %p1117_p5 = pnand %p1115_p13, %p1088_p0 }
  0x30   : > { %p1118_p6 = pneg %p1117_p5 }
  0x32   : > { %p1123_p10 = pnand %p1121_p9, %p1118_p6 }
  0x34   : > { %1126 = shalt.err (!%p1123_p10)
}
  0x35   : > { %s1127_s7 = scalar_lea.vmem %s1315_s10, 2048  ;;  %p1135_p4 = scmp.lt.s32.totalorder %s1315_s10, %s1315_s10 }
  0x36   : > { %p1128_p1 = scmp.ne.s32.totalorder %s1315_s10, %s1127_s7  ;;  %p1136_p7 = scmp.lt.s32.totalorder %s1127_s7, %s1127_s7 }
  0x38   : > { %p1130_p2 = pnand %p1128_p1, %p1088_p0  ;;  %p1137_p8 = por %p1136_p7, %p1135_p4 }
  0x3a   : > { %p1131_p3 = pneg %p1130_p2 }
  0x3c   : > { %p1138_p11 = pnand %p1137_p8, %p1131_p3 }
  0x3e   : > { %1141 = shalt.err (!%p1138_p11)
}
  0x3f   : > { %s1218_s23 = smov 128   ;;  %s1219_s25 = smov 8  }
  0x40   : > { %1031 = dma.hbm_to_vmem [thread:$0]  (!%p1311_p12), %s1467_s3, 2048, %s1315_s10, [#allocation6], %s1218_s23, %s1218_s23, %s1219_s25  }
  0x41   : > { %p1477_p13 = scmp.ne.s32.totalorder %s1475_s30, 0 }
  0x42   : > { %p1478_p0 = scmp.eq.s32.totalorder (!%p1477_p13), %s1275_s22, 0 }
  0x43   : > { %215 = sbr.rel (%p1477_p13) target bundleno = 1297 (0x511), region = 40 }
  0x4a   : > { %1187 = dma.done.wait (%p1478_p0), [#allocation3], 6144   ;;  %p1479_p5 = pmov %p1478_p0 }
  0x4b   : > { %p1480_p6 = pmov %p1478_p0 }
  0x4c   : > { %1189 = vsyncadd (%p1479_p5), [#allocation3], 4294961152 }
  0x4d   : > { %1191 = dma.done.wait (%p1480_p6), [#allocation6], 2048   ;;  %p1481_p9 = pmov %p1478_p0 }
  0x4e   : > { %v1220_v0 = vmov 0.0   ;;  %v1221_v1 = vmov 0.0|0.0   ;;  %v252_v2 = vld [vmem:[#allocation2 + $0x8] sm:$0xff]  ;;  %v255_v3 = vld [vmem:[#allocation2 + $0x20] sm:$0xff]  ;;  %v254_v6 = vld [vmem:[#allocation2 + $0x18] sm:$0xff]  ;;  %p246_p12 = scmp.lt.s32.totalorder %s1275_s22, 1 }
  0x4f   : > { %1193 = vsyncadd (%p1481_p9), [#allocation6], 4294965248  ;;  %380 = vmatprep.mubr.f32.mxu0 %v1220_v0  ;;  %967 = vmatprep.subr.bf16.mxu1 %v1221_v1  ;;  %v251_v4 = vld [vmem:[#allocation2] sm:$0xff]  ;;  %v935_v5 = vpack.c.bf16 %v255_v3, %v252_v2  ;;  %v258_v7 = vld [vmem:[#allocation2 + $0x38] sm:$0xff]  ;;  %vm1222_vm0 = vmmov 0   ;;  %vm527_vm1 = vcmask 64512  }
  0x50   : > { %v261_v8 = vld [vmem:[#allocation2 + $0x50] sm:$0xff]  ;;  %v937_v9 = vpack.c.bf16 %v254_v6, %v251_v4  ;;  %v260_v12 = vld [vmem:[#allocation2 + $0x48] sm:$0xff]  ;;  %v267_v14 = vld [vmem:[#allocation2 + $0x80] sm:$0xff]  ;;  %s247_s30 = scalar_select %p246_p12, %s1275_s22, 1  ;;  %887 = vmatprep.mubr.msk.f32.mxu1 %vm1222_vm0, %v1220_v0 }
  0x51   : > { %v939_v10 = vpack.c.bf16 %v261_v8, %v258_v7  ;;  %v257_v11 = vld [vmem:[#allocation2 + $0x30] sm:$0xff]  ;;  %v264_v13 = vld [vmem:[#allocation2 + $0x68] sm:$0xff]  ;;  %936 = vmatprep.subr.bf16.mxu0 %v935_v5  ;;  %v263_v17 = vld [vmem:[#allocation2 + $0x60] sm:$0xff]  ;;  %s243_s14 = sand.u32 1, %s1204_s19   ;;  %s814_s7 = sshll.u32 %s1275_s22, 7 }
  0x52   : > { %938 = vmatpush1.bf16.msra.mxu0 %v937_v9  ;;  %v941_v15 = vpack.c.bf16 %v260_v12, %v257_v11  ;;  %v943_v16 = vpack.c.bf16 %v267_v14, %v264_v13  ;;  %v266_v18 = vld [vmem:[#allocation2 + $0x78] sm:$0xff]  ;;  %v273_v20 = vld [vmem:[#allocation2 + $0xb0] sm:$0xff]  ;;  %v272_v24 = vld [vmem:[#allocation2 + $0xa8] sm:$0xff]  ;;  %s810_s8 = sshll.u32 %s247_s30, 3  ;;  %v301_v13 = vlaneseq  ;;  %s809_s15 = sshll.u32 %s243_s14, 3 }
  0x53   : > { %940 = vmatprep.subr.bf16.mxu0 %v939_v10  ;;  %v270_v19 = vld [vmem:[#allocation2 + $0x98] sm:$0xff]  ;;  %v945_v21 = vpack.c.bf16 %v266_v18, %v263_v17  ;;  %v269_v23 = vld [vmem:[#allocation2 + $0x90] sm:$0xff]  ;;  %v276_v25 = vld [vmem:[#allocation2 + $0xc8] sm:$0xff]  ;;  %s249_s11 = scalar_lea.vmem %s1464_s0, %s810_s8  ;;  %s245_s23 = scalar_lea.vmem [#allocation7], %s809_s15 }
  0x54   : > { %v947_v22 = vpack.c.bf16 %v273_v20, %v270_v19  ;;  %v279_v26 = vld [vmem:[#allocation2 + $0xe0] sm:$0xff]  ;;  %v253_v27 = vld [vmem:[#allocation2 + $0x10] sm:$0xff]  ;;  %v256_v28 = vld [vmem:[#allocation2 + $0x28] sm:$0xff]  ;;  %v949_v30 = vpack.c.bf16 %v272_v24, %v269_v23  ;;  %v302_v14 = vshrl.u32 %v301_v13, 7  ;;  %s720_s25 = sshll.u32 %s245_s23, 4  ;;  %s1422_s30 = scalar_lea.hbm %s1469_s5, %s814_s7  ;;  %s1424_s25 = int_to_ptr.vmem [resolvable:$true] %s720_s25 }
  0x55   : > { %v259_v29 = vld [vmem:[#allocation2 + $0x40] sm:$0xff]  ;;  %v968_v31 = vpack.c.bf16 %v256_v28, %v253_v27  ;;  %v262_v32 = vld [vmem:[#allocation2 + $0x58] sm:$0xff]  ;;  %v951_v33 = vpack.c.bf16 %v279_v26, %v276_v25  ;;  %v285_v37 = vld [vmem:[#allocation2 + $0x110] sm:$0xff]  ;;  %s707_s8 = scalar_lea.sflag [#allocation4], %s243_s14  ;;  %s1142_s10 = scalar_lea.vmem %s1424_s25, 128 }
  0x56   : > { %942 = vmatpush1.bf16.msra.mxu0 %v941_v15  ;;  %v275_v34 = vld [vmem:[#allocation2 + $0xc0] sm:$0xff]  ;;  %v278_v35 = vld [vmem:[#allocation2 + $0xd8] sm:$0xff]  ;;  %v971_v38 = vpack.c.bf16 %v262_v32, %v259_v29  ;;  %v265_v39 = vld [vmem:[#allocation2 + $0x70] sm:$0xff]  ;;  %v307_v15 = vsub.s32 1, %v302_v14  ;;  %v303_v17 = vsub.s32 0, %v302_v14  ;;  %v311_v24 = vsub.s32 2, %v302_v14  ;;  %p1143_p10 = scmp.ne.s32.totalorder %s1424_s25, %s1142_s10 }
  0x57   : > { %944 = vmatprep.subr.bf16.mxu0 %v943_v16  ;;  %v282_v36 = vld [vmem:[#allocation2 + $0xf8] sm:$0xff]  ;;  %969 = vmatpush3.bf16.msra.mxu1 %v968_v31  ;;  %v268_v40 = vld [vmem:[#allocation2 + $0x88] sm:$0xff]  ;;  %v953_v41 = vpack.c.bf16 %v278_v35, %v275_v34  ;;  %v281_v43 = vld [vmem:[#allocation2 + $0xf0] sm:$0xff]  ;;  %p1482_p1 = scmp.ne.s32.totalorder %s1473_s28, 0  ;;  %s1223_s22 = smov [#allocation7]  }
  0x58   : > { %970 = vmatprep.subr.bf16.mxu1 %v1221_v1  ;;  %v955_v42 = vpack.c.bf16 %v285_v37, %v282_v36  ;;  %v284_v44 = vld [vmem:[#allocation2 + $0x108] sm:$0xff]  ;;  %v291_v46 = vld [vmem:[#allocation2 + $0x140] sm:$0xff]  ;;  %v974_v47 = vpack.c.bf16 %v268_v40, %v265_v39  ;;  %v274_v49 = vld [vmem:[#allocation2 + $0xb8] sm:$0xff]  ;;  %s1146_s9 = sshll.u32 %s1223_s22, 4  ;;  %s1147_s9 = int_to_ptr.vmem [resolvable:$false] %s1146_s9 }
  0x59   : > { %v288_v45 = vld [vmem:[#allocation2 + $0x128] sm:$0xff]  ;;  %v271_v48 = vld [vmem:[#allocation2 + $0xa0] sm:$0xff]  ;;  %v957_v50 = vpack.c.bf16 %v284_v44, %v281_v43  ;;  %v290_v53 = vld [vmem:[#allocation2 + $0x138] sm:$0xff]  ;;  %p1144_p2 = pnand %p1143_p10, %p1482_p1  ;;  %p1149_p4 = scmp.lt.s32.totalorder %s1424_s25, %s1147_s9 }
  0x5a   : > { %946 = vmatpush1.bf16.msra.mxu0 %v945_v21  ;;  %v959_v51 = vpack.c.bf16 %v291_v46, %v288_v45  ;;  %v287_v52 = vld [vmem:[#allocation2 + $0x120] sm:$0xff]  ;;  %v294_v54 = vld [vmem:[#allocation2 + $0x158] sm:$0xff]  ;;  %v297_v55 = vld [vmem:[#allocation2 + $0x170] sm:$0xff]  ;;  %v977_v56 = vpack.c.bf16 %v274_v49, %v271_v48 }
  0x5b   : > { %948 = vmatprep.subr.bf16.mxu0 %v947_v22  ;;  %972 = vmatpush3.bf16.msra.mxu1 %v971_v38  ;;  %v277_v57 = vld [vmem:[#allocation2 + $0xd0] sm:$0xff]  ;;  %v280_v58 = vld [vmem:[#allocation2 + $0xe8] sm:$0xff]  ;;  %v961_v59 = vpack.c.bf16 %v290_v53, %v287_v52  ;;  %v963_v60 = vpack.c.bf16 %v297_v55, %v294_v54  ;;  %v283_v2 = vld [vmem:[#allocation2 + $0x100] sm:$0xff]  ;;  %p1145_p3 = pneg %p1144_p2 }
  0x5c   : > { %973 = vmatprep.subr.bf16.mxu1 %v1221_v1  ;;  %v293_v61 = vld [vmem:[#allocation2 + $0x150] sm:$0xff]  ;;  %v296_v62 = vld [vmem:[#allocation2 + $0x168] sm:$0xff]  ;;  %v980_v63 = vpack.c.bf16 %v280_v58, %v277_v57  ;;  %v286_v3 = vld [vmem:[#allocation2 + $0x118] sm:$0xff] }
  0x5d   : > { %v965_v4 = vpack.c.bf16 %v296_v62, %v293_v61  ;;  %v983_v5 = vpack.c.bf16 %v286_v3, %v283_v2  ;;  %v289_v6 = vld [vmem:[#allocation2 + $0x130] sm:$0xff]  ;;  %v292_v7 = vld [vmem:[#allocation2 + $0x148] sm:$0xff]  ;;  %v295_v10 = vld [vmem:[#allocation2 + $0x160] sm:$0xff] }
  0x5e   : > { %950 = vmatpush1.bf16.msra.mxu0 %v949_v30  ;;  %v250_v8 = vld [vmem:[%s249_s11] sm:$0xff]  ;;  %v986_v9 = vpack.c.bf16 %v292_v7, %v289_v6  ;;  %v298_v11 = vld [vmem:[#allocation2 + $0x178] sm:$0xff]  ;;  %v613_v37 = vld [vmem:[#allocation5 + $0x8] sm:$0xff]  ;;  %s1148_s11 = scalar_lea.vmem %s1147_s9, 256 }
  0x5f   : > { %952 = vmatprep.subr.bf16.mxu0 %v951_v33  ;;  %975 = vmatpush3.bf16.msra.mxu1 %v974_v47  ;;  %v989_v12 = vpack.c.bf16 %v298_v11, %v295_v10  ;;  %v299_v16 = vld [vmem:[%s1466_s2] sm:$0x7]  ;;  %v615_v40 = vld [vmem:[#allocation5 + $0x18] sm:$0xff]  ;;  %v617_v43 = vld [vmem:[#allocation5 + $0x28] sm:$0xff]  ;;  %p1150_p7 = scmp.lt.s32.totalorder %s1148_s11, %s1142_s10 }
  0x60   : > { %976 = vmatprep.subr.bf16.mxu1 %v1221_v1  ;;  %v308_v18 = vrot.slane %v299_v16, %v307_v15  ;;  %v304_v20 = vrot.slane %v299_v16, %v303_v17  ;;  %v312_v25 = vrot.slane %v299_v16, %v311_v24  ;;  %v614_v38 = vld [vmem:[#allocation5 + $0x10] sm:$0xff]  ;;  %v619_v46 = vld [vmem:[#allocation5 + $0x38] sm:$0xff]  ;;  %v620_v48 = vld [vmem:[#allocation5 + $0x40] sm:$0xff] }
  0x61   : > { %v618_v45 = vld [vmem:[#allocation5 + $0x30] sm:$0xff]  ;;  %v621_v49 = vld [vmem:[#allocation5 + $0x48] sm:$0xff]  ;;  %v623_v52 = vld [vmem:[#allocation5 + $0x58] sm:$0xff]  ;;  %p1151_p8 = por %p1150_p7, %p1149_p4 }
  0x62   : > { %954 = vmatpush1.bf16.msra.mxu0 %v953_v41  ;;  %v995_v41 = vpack.c.bf16 %v615_v40, %v614_v38  ;;  %v1001_v47 = vpack.c.bf16 %v619_v46, %v618_v45  ;;  %v624_v54 = vld [vmem:[#allocation5 + $0x60] sm:$0xff]  ;;  %v625_v55 = vld [vmem:[#allocation5 + $0x68] sm:$0xff]  ;;  %v626_v57 = vld [vmem:[#allocation5 + $0x70] sm:$0xff] }
  0x63   : > { %956 = vmatprep.subr.bf16.mxu0 %v955_v42  ;;  %978 = vmatpush3.bf16.msra.mxu1 %v977_v56  ;;  %v616_v42 = vld [vmem:[#allocation5 + $0x20] sm:$0xff]  ;;  %v1010_v56 = vpack.c.bf16 %v625_v55, %v624_v54  ;;  %v627_v58 = vld [vmem:[#allocation5 + $0x78] sm:$0xff]  ;;  %v812_v3 = vld [vmem:[%s1468_s4] ss:$0 sm:$0xff]  ;;  %p1152_p11 = pnand %p1151_p8, %p1145_p3 }
  0x64   : > { %979 = vmatprep.subr.bf16.mxu1 %v1221_v1  ;;  %v998_v44 = vpack.c.bf16 %v617_v43, %v616_v42 }
  0x66   : > { %958 = vmatpush1.bf16.msra.mxu0 %v957_v50  ;;  %v1004_v50 = vpack.c.bf16 %v621_v49, %v620_v48 }
  0x67   : > { %960 = vmatprep.subr.bf16.mxu0 %v959_v51  ;;  %981 = vmatpush3.bf16.msra.mxu1 %v980_v63  ;;  %v622_v51 = vld [vmem:[#allocation5 + $0x50] sm:$0xff] }
  0x68   : > { %982 = vmatprep.subr.bf16.mxu1 %v1221_v1  ;;  %v1007_v53 = vpack.c.bf16 %v623_v52, %v622_v51 }
  0x6a   : > { %962 = vmatpush1.bf16.msra.mxu0 %v961_v59  ;;  %v1013_v59 = vpack.c.bf16 %v627_v58, %v626_v57 }
  0x6b   : > { %964 = vmatprep.subr.bf16.mxu0 %v963_v60  ;;  %984 = vmatpush3.bf16.msra.mxu1 %v983_v5 }
  0x6c   : > { %985 = vmatprep.subr.bf16.mxu1 %v1221_v1 }
  0x6e   : > { %966 = vmatpush1.bf16.msra.mxu0 %v965_v4 }
  0x6f   : > { %991 = vmatprep.subr.bf16.mxu0 %v1221_v1  ;;  %987 = vmatpush3.bf16.msra.mxu1 %v986_v9 }
  0x70   : > { %988 = vmatprep.subr.bf16.mxu1 %v1221_v1 }
  0x71   : > { %381 = vmatmul.mubr.f32.vlgmr.msra.gmra.mrb[0].mxu0 %v250_v8 }
  0x72   : > { %932 = vmatprep.mubr.msk.f32.mxu0 %vm1222_vm0, %v1220_v0 }
  0x73   : > { %990 = vmatpush3.bf16.msra.mxu1 %v989_v12 }
  0x74   : > { %890 = vmatprep.subr.mxu1 %v1220_v0 }
  0x76   : > { %888 = vmatmul.mubr.f32.vlgmr.msra.gmra.mrb[0].mxu1 %v250_v8 }
  0x77   : > { %892 = vmatprep.mubr.msk.f32.mxu1 %vm1222_vm0, %v1220_v0 }
 0x144   : > { %v382_v19 = vpop.f32.mrb[0].mxu0 }
 0x145   : > { %v384_v21 = vpop.f32.mrb[1].mxu0  ;;  %v383_v23 = vadd.f32 %v382_v19, %v304_v20 }
 0x146   : > { %v385_v22 = vadd.f32 %v384_v21, %v308_v18 }
 0x148   : > { %891 = vmatpush3.xpose.msra.mxu1 %v385_v22 }
 0x149   : > { %895 = vmatprep.subr.mxu1 %v1220_v0  ;;  %v453_v26 = vpop.f32.mrb[0].mxu1 }
 0x14a   : > { %v454_v27 = vadd.f32 %v453_v26, %v312_v25  ;;  %v889_v28 = vpop.f32.mrb[1].mxu1 }
 0x14b   : > { %893 = vmatmul.mubr.f32.vlgmr.msra.gmra.mrb[2].mxu1 %v383_v23 }
 0x14c   : > { %897 = vmatprep.mubr.msk.f32.mxu1 %vm1222_vm0, %v1220_v0  ;;  %896 = vmatpush3.msra.mxu1 %v454_v27  ;;  %v612_v0 = vld [vmem:[#allocation5] sm:$0xff] }
 0x14d   : > { %v992_v39 = vpack.c.bf16 %v613_v37, %v612_v0 }
 0x14f   : > { %993 = vmatpush3.bf16.msra.mxu0 %v992_v39 }
 0x150   : > { %994 = vmatprep.subr.bf16.mxu0 %v1221_v1 }
 0x153   : > { %996 = vmatpush3.bf16.msra.mxu0 %v995_v41 }
 0x154   : > { %997 = vmatprep.subr.bf16.mxu0 %v1221_v1 }
 0x157   : > { %999 = vmatpush3.bf16.msra.mxu0 %v998_v44 }
 0x158   : > { %1000 = vmatprep.subr.bf16.mxu0 %v1221_v1 }
 0x15b   : > { %1002 = vmatpush3.bf16.msra.mxu0 %v1001_v47 }
 0x15c   : > { %1003 = vmatprep.subr.bf16.mxu0 %v1221_v1 }
 0x15f   : > { %1005 = vmatpush3.bf16.msra.mxu0 %v1004_v50 }
 0x160   : > { %1006 = vmatprep.subr.bf16.mxu0 %v1221_v1 }
 0x163   : > { %1008 = vmatpush3.bf16.msra.mxu0 %v1007_v53 }
 0x164   : > { %1009 = vmatprep.subr.bf16.mxu0 %v1221_v1 }
 0x167   : > { %1011 = vmatpush3.bf16.msra.mxu0 %v1010_v56 }
 0x168   : > { %1012 = vmatprep.subr.bf16.mxu0 %v1221_v1 }
 0x16b   : > { %1014 = vmatpush3.bf16.msra.mxu0 %v1013_v59 }
 0x21e   : > { %v523_v29 = vpop.f32.mrb[2].mxu1 }
 0x21f   : > { %v894_v30 = vpop.f32.mrb[3].mxu1  ;;  %v528_v31 = vsel %vm527_vm1, %v523_v29, -inf }
 0x220   : > { %529 = vmax.xlane.f32.xlu0 %v528_v31 }
 0x2ad   : > { %v530_v32 = vpop.xlane.xlu0 %529 }
 0x2ae   : > { %v531_v33 = vsub.f32 %v523_v29, %v530_v32 }
 0x2b0   : > { %v532_v34 = vmul.f32 1.442695, %v531_v33 }
 0x2b2   : > { %1082 = vpow2.f32 %v532_v34 }
 0x2bc   : > { %v1083_v35 = vpop.eup %1082 }
 0x2bd   : > { %v534_v36 = vsel %vm527_vm1, %v1083_v35, 0.0 }
 0x2be   : > { %535 = vadd.xlane.f32.xlu0 %v534_v36 }
 0x34b   : > { %v536_v60 = vpop.xlane.xlu0 %535 }
 0x34c   : > { %1084 = vrcp.f32 %v536_v60 }
 0x356   : > { %v1085_v61 = vpop.eup %1084 }
 0x357   : > { %v538_v62 = vmul.f32 %v1085_v61, %v1083_v35 }
 0x359   : > { %898 = vmatmul.mubr.msk.f32.vlgmr.msra.gmra.mrb[4].mxu1 %vm527_vm1, %v538_v62 }
 0x42c   : > { %v608_v63 = vpop.f32.mrb[4].mxu1 }
 0x42d   : > { %v899_v2 = vpop.f32.mrb[5].mxu1  ;;  %933 = vmatmul.mubr.f32.vlgmr.msra.gmra.mrb[2].mxu0 %v608_v63 }
 0x500   : > { %v701_v1 = vpop.f32.mrb[2].mxu0 }
 0x501   : > { %v702_v4 = vadd.f32 %v812_v3, %v701_v1  ;;  %v934_v5 = vpop.f32.mrb[3].mxu0 }
 0x503   : > { %705 = vst [vmem:[%s245_s23] sm:$0xff] %v702_v4 }
 0x504   : > { %1155 = shalt.err (!%p1152_p11)
}
 0x505   : > { %s1156_s12 = scalar_lea.hbm %s1422_s30, 128  ;;  %s1160_s15 = scalar_lea.hbm %s1469_s5, 256 }
 0x506   : > { %p1157_p13 = scmp.ne.s32.totalorder %s1422_s30, %s1156_s12  ;;  %p1161_p6 = scmp.lt.u32.totalorder %s1422_s30, %s1469_s5 }
 0x507   : > { %p1162_p9 = scmp.lt.u32.totalorder %s1160_s15, %s1156_s12  ;;  %p1164_p10 = scmp.lt.u32.totalorder %s1156_s12, %s1422_s30 }
 0x508   : > { %p1158_p0 = pnand %p1157_p13, %p1482_p1 }
 0x509   : > { %p1163_p12 = por %p1162_p9, %p1161_p6 }
 0x50a   : > { %p1159_p5 = pneg %p1158_p0 }
 0x50b   : > { %p1165_p2 = por %p1164_p10, %p1163_p12 }
 0x50d   : > { %p1166_p3 = pnand %p1165_p2, %p1159_p5 }
 0x50f   : > { %1169 = shalt.err (!%p1166_p3)
}
 0x510   : > { %1023 = dma.vmem_to_hbm [thread:$0]  (%p1482_p1), %s1424_s25, 128, %s1422_s30, %s707_s8  }
 0x511 PF: > { %p1040_p4 = scmp.ge.s32.totalorder %s1212_s21, 2  ;;  %s732_s7 = sand.u32 1, %s1200_s18  }
 0x512   : > { %p1483_p7 = scmp.ne.s32.totalorder %s1474_s29, 0  ;;  %s733_s23 = scalar_lea.sflag [#allocation4], %s732_s7 }
 0x514   : > { %p1033_p8 = pnand %p1040_p4, %p1483_p7 }
 0x516   : > { %1195 = dma.done.wait (!%p1033_p8), %s733_s23, 128  }
 0x517   : > { %1197 = vsyncadd (!%p1033_p8), %s733_s23, 4294967168  ;;  %p17_p11 = scmp.ge.s32.totalorder %s1279_s24, 4   ;;  %s1484_s18 = smov %s1204_s19 }
 0x518   : > { %s1485_s19 = smov %s1208_s20  ;;  %s1486_s20 = smov %s1290_s27 }
 0x519   : > { %s1487_s21 = smov %s1279_s24  ;;  %19 = sbr.rel (!%p17_p11) target bundleno = 5 (0x5), region = 84 }
 0x520   :  { %738 = vsyncpa [#allocation3], 1 }
 0x521   :  { %740 = vsyncpa [#allocation3 + $0x1], 1 }
 0x522   :  { %741 = vsyncpa [#allocation6], 1 }
 0x523   :  { %742 = vsyncpa [#allocation4], 1 }
 0x524   :  { %744 = vsyncpa [#allocation4 + $0x1], 1 }

</bundles_post_ra>
